<compile_context>
chip_gen: v7x
topology: tpu7x:2x2x1
jax: 0.10.0
libtpu: 0.0.40
codegen_flags: <defaults>
</compile_context>

<pallas_src>
import jax
import jax.numpy as jnp
from jax.experimental import pallas as pl
from jax.experimental.pallas import tpu as pltpu


def _round_up(n, m):
    return (n + m - 1) // m * m


# ----------------------------------------------------------------------------- kernel

def qnet_kernel(x_ref, w1_ref, b1_ref, w2_ref, b2_ref, w3_ref, b3_ref, o_ref):
    """One batch tile of relu(relu(x@w1+b1)@w2+b2)@w3+b3.

    Weights may be bf16 (v6e/v7x storage); every matmul accumulates in f32 via
    preferred_element_type, and bias-add / relu are done in f32 (v5e-safe)."""
    wdt = w1_ref.dtype
    x = x_ref[...].astype(wdt)                                        # (TB, DIN_P)

    h = jnp.dot(x, w1_ref[...], preferred_element_type=jnp.float32) + b1_ref[...]
    h = jnp.maximum(h, 0.0).astype(wdt)                               # (TB, H_P)

    h = jnp.dot(h, w2_ref[...], preferred_element_type=jnp.float32) + b2_ref[...]
    h = jnp.maximum(h, 0.0).astype(wdt)                               # (TB, H_P)

    o_ref[...] = (jnp.dot(h, w3_ref[...], preferred_element_type=jnp.float32)
                  + b3_ref[...]).astype(o_ref.dtype)                  # (TB, OUT)


# ----------------------------------------------------------------------- init / pack

def kaiming_uniform_relu(key, out_features, in_features):
    """nn.init.kaiming_uniform_(weight, nonlinearity='relu') for a PyTorch Linear weight
    (out_features, in_features): fan_in = in_features, gain = sqrt(2),
    bound = gain * sqrt(3 / fan_in)."""
    gain = jnp.sqrt(2.0)
    bound = gain * jnp.sqrt(3.0 / in_features)
    return jax.random.uniform(key, (out_features, in_features),
                              minval=-bound, maxval=bound, dtype=jnp.float32)


def init_q_net_params(key, input_dim, hidden_dim, output_dim):
    """PyTorch-equivalent init; weights returned transposed to (in, out)."""
    k1, k2, k3 = jax.random.split(key, 3)
    return {
        "w1": kaiming_uniform_relu(k1, hidden_dim, input_dim).T,
        "b1": jnp.zeros((hidden_dim,), jnp.float32),
        "w2": kaiming_uniform_relu(k2, hidden_dim, hidden_dim).T,
        "b2": jnp.zeros((hidden_dim,), jnp.float32),
        "w3": kaiming_uniform_relu(k3, output_dim, hidden_dim).T,
        "b3": jnp.zeros((output_dim,), jnp.float32),
    }


def pack_q_net_params(params, input_dim, hidden_dim, output_dim,
                      param_dtype=jnp.float32):
    """Pad the hidden axis to a multiple of 128 (lane-dense in-kernel matmuls) and the
    input axis to a multiple of 8 (sublane-aligned contraction).  The OUTPUT axis is not
    padded: the kernel stores (TB, output_dim) directly.  Zero padding is exact: padded
    hidden units stay 0 through relu and contribute nothing downstream."""
    din_p = _round_up(input_dim, 8)
    h_p = _round_up(hidden_dim, 128)

    def pad_w(a, r, c):
        return jnp.zeros((r, c), jnp.float32).at[:a.shape[0], :a.shape[1]].set(a)

    def pad_b(b, c):
        return jnp.zeros((1, c), jnp.float32).at[0, :b.shape[0]].set(b)

    return {
        # weights: optionally bf16 storage (v6e/v7x); matmuls still accumulate in f32
        "w1": pad_w(params["w1"], din_p, h_p).astype(param_dtype),
        "w2": pad_w(params["w2"], h_p, h_p).astype(param_dtype),
        "w3": pad_w(params["w3"], h_p, output_dim).astype(param_dtype),
        # biases: kept f32 (v5e has no bf16 VPU; elementwise math stays f32)
        "b1": pad_b(params["b1"], h_p),
        "b2": pad_b(params["b2"], h_p),
        "b3": pad_b(params["b3"], output_dim),
        "in_dim": input_dim, "in_pad": din_p,
        "hidden_dim": hidden_dim, "hidden_pad": h_p,
        "out_dim": output_dim,
    }


# ---------------------------------------------------------------------------- forward

def q_net_forward(x, packed, *, block_batch=2048):
    """x: (B, input_dim) float32; packed: output of pack_q_net_params."""
    B, din = x.shape
    assert din == packed["in_dim"]
    din_p, h_p = packed["in_pad"], packed["hidden_pad"]
    hidden, out_dim = packed["hidden_dim"], packed["out_dim"]
    x = x.astype(jnp.float32)

    # Batch tile: always a multiple of 8 sublanes; keep >= 2 grid steps when the batch
    # allows it so the "parallel" axis actually spans both TensorCores on v7x.
    TB = _round_up(max(8, min(block_batch, B)), 8)
    if B >= 16:
        TB = min(TB, _round_up((B + 1) // 2, 8))
    Bp = _round_up(B, TB)
    grid = (Bp // TB,)

    # Only a narrow (din_p-lane) zero-pad pass, and only when actually needed.
    if (Bp, din_p) == (B, din):
        xp = x
    else:
        xp = jnp.zeros((Bp, din_p), jnp.float32).at[:B, :din].set(x)

    w1, w2, w3 = packed["w1"], packed["w2"], packed["w3"]
    b1, b2, b3 = packed["b1"], packed["b2"], packed["b3"]
    param_bytes = sum(a.size * a.dtype.itemsize for a in (w1, b1, w2, b2, w3, b3))

    # Real (unpadded) work so XLA doesn't over-serialize surrounding ops.
    cost = pl.CostEstimate(
        flops=2 * Bp * (din * hidden + hidden * hidden + hidden * out_dim),
        transcendentals=0,
        bytes_accessed=xp.size * xp.dtype.itemsize + param_bytes + Bp * out_dim * 4)

    const = lambda i: (0, 0)   # params: fetched once, VMEM-resident across batch tiles
    out = pl.pallas_call(
        qnet_kernel,
        out_shape=jax.ShapeDtypeStruct((Bp, out_dim), jnp.float32),
        grid=grid,
        in_specs=[
            pl.BlockSpec((TB, din_p), lambda i: (i, 0)),   # x: tiled over batch
            pl.BlockSpec((din_p, h_p), const),             # w1
            pl.BlockSpec((1, h_p), const),                 # b1
            pl.BlockSpec((h_p, h_p), const),               # w2
            pl.BlockSpec((1, h_p), const),                 # b2
            pl.BlockSpec((h_p, out_dim), const),           # w3
            pl.BlockSpec((1, out_dim), const),             # b3
        ],
        out_specs=pl.BlockSpec((TB, out_dim), lambda i: (i, 0)),  # narrow, unpadded
        compiler_params=pltpu.CompilerParams(
            dimension_semantics=("parallel",),             # megacore split on v7x
        ),
        cost_estimate=cost,
    )(xp, w1, b1, w2, b2, w3, b3)

    return out[:B]


def q_net_ref(x, params):
    """Pure-JAX reference of the same forward pass (unpadded)."""
    h1 = jnp.maximum(x @ params["w1"] + params["b1"], 0.0)
    h2 = jnp.maximum(h1 @ params["w2"] + params["b2"], 0.0)
    return h2 @ params["w3"] + params["b3"]


if __name__ == "__main__":
    # Small shapes consistent with a DQN Q-network: state dim 4, hidden 32, 2 actions.
    batch, input_dim, hidden_dim, output_dim = 32, 4, 32, 2

    key = jax.random.PRNGKey(0)
    kx, kp = jax.random.split(key)
    x = jax.random.normal(kx, (batch, input_dim), dtype=jnp.float32)

    params = init_q_net_params(kp, input_dim, hidden_dim, output_dim)
    ref = q_net_ref(x, params)

    # f32 path (matches the PyTorch module up to MXU accumulation order).
    packed_f32 = pack_q_net_params(params, input_dim, hidden_dim, output_dim,
                                   param_dtype=jnp.float32)
    out = jax.block_until_ready(q_net_forward(x, packed_f32))
    assert out.shape == (batch, output_dim)
    assert jnp.allclose(out, ref, atol=1e-4, rtol=1e-4), float(jnp.max(jnp.abs(out - ref)))

    # bf16 weight-storage path (recommended default for the large-batch training /
    # target-network eval path on v6e/v7x): f32 accumulation, so only input-rounding
    # error remains.  Validated loosely here per the precision concern in the review.
    packed_bf16 = pack_q_net_params(params, input_dim, hidden_dim, output_dim,
                                    param_dtype=jnp.bfloat16)
    out_bf16 = jax.block_until_ready(q_net_forward(x, packed_bf16))
    assert out_bf16.shape == (batch, output_dim)
    assert jnp.allclose(out_bf16, ref, atol=2.5e-1, rtol=1e-1), \
        float(jnp.max(jnp.abs(out_bf16 - ref)))

    print("KERNEL_OK")
</pallas_src>

<mosaic_0001>
module attributes {stable_mosaic.version = 11 : i64} {
  func.func @qnet_kernel(%arg0: i32, %arg1: memref<16x8xf32, #tpu.memory_space<vmem>>, %arg2: memref<8x128xf32, #tpu.memory_space<vmem>>, %arg3: memref<1x128xf32, #tpu.memory_space<vmem>>, %arg4: memref<128x128xf32, #tpu.memory_space<vmem>>, %arg5: memref<1x128xf32, #tpu.memory_space<vmem>>, %arg6: memref<128x2xf32, #tpu.memory_space<vmem>>, %arg7: memref<1x2xf32, #tpu.memory_space<vmem>>, %arg8: memref<16x2xf32, #tpu.memory_space<vmem>>) attributes {dimension_semantics = [#tpu.dimension_semantics<parallel>], iteration_bounds = array<i64: 2>, scalar_prefetch = 0 : i64, scratch_operands = 0 : i64, tpu.core_type = #tpu.core_type<tc>, window_params = [{transform_indices = @transform_0, window_bounds = array<i64: 16, 8>}, {pipeline_mode = #tpu.pipeline_mode<synchronous>, transform_indices = @transform_1, window_bounds = array<i64: 8, 128>}, {pipeline_mode = #tpu.pipeline_mode<synchronous>, transform_indices = @transform_2, window_bounds = array<i64: 1, 128>}, {pipeline_mode = #tpu.pipeline_mode<synchronous>, transform_indices = @transform_3, window_bounds = array<i64: 128, 128>}, {pipeline_mode = #tpu.pipeline_mode<synchronous>, transform_indices = @transform_4, window_bounds = array<i64: 1, 128>}, {pipeline_mode = #tpu.pipeline_mode<synchronous>, transform_indices = @transform_5, window_bounds = array<i64: 128, 2>}, {pipeline_mode = #tpu.pipeline_mode<synchronous>, transform_indices = @transform_6, window_bounds = array<i64: 1, 2>}, {transform_indices = @transform_7, window_bounds = array<i64: 16, 2>}]} {
    %c0 = arith.constant 0 : index
    %c0_0 = arith.constant 0 : index
    %0 = vector.load %arg1[%c0, %c0_0] : memref<16x8xf32, #tpu.memory_space<vmem>>, vector<16x8xf32>
    %c0_1 = arith.constant 0 : index
    %c0_2 = arith.constant 0 : index
    %1 = vector.load %arg2[%c0_1, %c0_2] : memref<8x128xf32, #tpu.memory_space<vmem>>, vector<8x128xf32>
    %cst = arith.constant dense<0.000000e+00> : vector<16x128xf32>
    %2 = tpu.matmul %0, %1, %cst {dimension_numbers = #tpu.dot_dimension_numbers<[1], [0], [0], [1], [0, 0, 1, 1], [], []>} : vector<16x8xf32>, vector<8x128xf32>, vector<16x128xf32> -> vector<16x128xf32>
    %c0_3 = arith.constant 0 : index
    %c0_4 = arith.constant 0 : index
    %3 = vector.load %arg3[%c0_3, %c0_4] : memref<1x128xf32, #tpu.memory_space<vmem>>, vector<1x128xf32>
    %4 = vector.broadcast %3 : vector<1x128xf32> to vector<16x128xf32>
    %5 = arith.addf %2, %4 : vector<16x128xf32>
    %cst_5 = arith.constant 0.000000e+00 : f32
    %6 = vector.broadcast %cst_5 : f32 to vector<16x128xf32>
    %7 = arith.maximumf %5, %6 : vector<16x128xf32>
    %c0_6 = arith.constant 0 : index
    %c0_7 = arith.constant 0 : index
    %8 = vector.load %arg4[%c0_6, %c0_7] : memref<128x128xf32, #tpu.memory_space<vmem>>, vector<128x128xf32>
    %cst_8 = arith.constant dense<0.000000e+00> : vector<16x128xf32>
    %9 = tpu.matmul %7, %8, %cst_8 {dimension_numbers = #tpu.dot_dimension_numbers<[1], [0], [0], [1], [0, 0, 1, 1], [], []>} : vector<16x128xf32>, vector<128x128xf32>, vector<16x128xf32> -> vector<16x128xf32>
    %c0_9 = arith.constant 0 : index
    %c0_10 = arith.constant 0 : index
    %10 = vector.load %arg5[%c0_9, %c0_10] : memref<1x128xf32, #tpu.memory_space<vmem>>, vector<1x128xf32>
    %11 = vector.broadcast %10 : vector<1x128xf32> to vector<16x128xf32>
    %12 = arith.addf %9, %11 : vector<16x128xf32>
    %cst_11 = arith.constant 0.000000e+00 : f32
    %13 = vector.broadcast %cst_11 : f32 to vector<16x128xf32>
    %14 = arith.maximumf %12, %13 : vector<16x128xf32>
    %c0_12 = arith.constant 0 : index
    %c0_13 = arith.constant 0 : index
    %15 = vector.load %arg6[%c0_12, %c0_13] : memref<128x2xf32, #tpu.memory_space<vmem>>, vector<128x2xf32>
    %cst_14 = arith.constant dense<0.000000e+00> : vector<16x2xf32>
    %16 = tpu.matmul %14, %15, %cst_14 {dimension_numbers = #tpu.dot_dimension_numbers<[1], [0], [0], [1], [0, 0, 1, 1], [], []>} : vector<16x128xf32>, vector<128x2xf32>, vector<16x2xf32> -> vector<16x2xf32>
    %c0_15 = arith.constant 0 : index
    %c0_16 = arith.constant 0 : index
    %17 = vector.load %arg7[%c0_15, %c0_16] : memref<1x2xf32, #tpu.memory_space<vmem>>, vector<1x2xf32>
    %18 = vector.broadcast %17 : vector<1x2xf32> to vector<16x2xf32>
    %19 = arith.addf %16, %18 : vector<16x2xf32>
    %c0_17 = arith.constant 0 : index
    %c0_18 = arith.constant 0 : index
    %20 = vector.load %arg8[%c0_17, %c0_18] : memref<16x2xf32, #tpu.memory_space<vmem>>, vector<16x2xf32>
    tpu.vector_store %arg8[%c0_17, %c0_18], %19 {strides = array<i32>} : memref<16x2xf32, #tpu.memory_space<vmem>>, vector<16x2xf32>,
    return
  }
  func.func @transform_0(%arg0: i32) -> (i32, i32) {
    %c0_i32 = arith.constant 0 : i32
    %c0_i32_0 = arith.constant 0 : i32
    return %arg0, %c0_i32 : i32, i32
  }
  func.func @transform_1(%arg0: i32) -> (i32, i32) {
    %c0_i32 = arith.constant 0 : i32
    %c0_i32_0 = arith.constant 0 : i32
    %c0_i32_1 = arith.constant 0 : i32
    return %c0_i32, %c0_i32_0 : i32, i32
  }
  func.func @transform_2(%arg0: i32) -> (i32, i32) {
    %c0_i32 = arith.constant 0 : i32
    %c0_i32_0 = arith.constant 0 : i32
    %c0_i32_1 = arith.constant 0 : i32
    return %c0_i32, %c0_i32_0 : i32, i32
  }
  func.func @transform_3(%arg0: i32) -> (i32, i32) {
    %c0_i32 = arith.constant 0 : i32
    %c0_i32_0 = arith.constant 0 : i32
    %c0_i32_1 = arith.constant 0 : i32
    return %c0_i32, %c0_i32_0 : i32, i32
  }
  func.func @transform_4(%arg0: i32) -> (i32, i32) {
    %c0_i32 = arith.constant 0 : i32
    %c0_i32_0 = arith.constant 0 : i32
    %c0_i32_1 = arith.constant 0 : i32
    return %c0_i32, %c0_i32_0 : i32, i32
  }
  func.func @transform_5(%arg0: i32) -> (i32, i32) {
    %c0_i32 = arith.constant 0 : i32
    %c0_i32_0 = arith.constant 0 : i32
    %c0_i32_1 = arith.constant 0 : i32
    return %c0_i32, %c0_i32_0 : i32, i32
  }
  func.func @transform_6(%arg0: i32) -> (i32, i32) {
    %c0_i32 = arith.constant 0 : i32
    %c0_i32_0 = arith.constant 0 : i32
    %c0_i32_1 = arith.constant 0 : i32
    return %c0_i32, %c0_i32_0 : i32, i32
  }
  func.func @transform_7(%arg0: i32) -> (i32, i32) {
    %c0_i32 = arith.constant 0 : i32
    %c0_i32_0 = arith.constant 0 : i32
    return %arg0, %c0_i32 : i32, i32
  }
}

</mosaic_0001>

<bundles_post_ra>
// kernel: tpu_custom_call.1
= control target key start
LH: loop header
LB: loop body
LE: loop exit
PB: predicated region body
PF: predicated region fallthrough
CT: control target
= control target key end

     0   :  { %s883_s24 = smov 0   ;;  %s1015_s0 = inlined_call_operand.vmem [shape: f32[32,8], index: 0, kind: input, shape index: {}]   ;;  %s1016_s1 = inlined_call_operand.vmem [shape: f32[8,128], index: 1, kind: input, shape index: {}]   ;;  %s1017_s2 = inlined_call_operand.vmem [shape: f32[1,128], index: 2, kind: input, shape index: {}]   ;;  %s1018_s3 = inlined_call_operand.vmem [shape: f32[128,128], index: 3, kind: input, shape index: {}]   ;;  %s1019_s4 = inlined_call_operand.vmem [shape: f32[1,128], index: 4, kind: input, shape index: {}]   ;;  %s1020_s5 = inlined_call_operand.vmem [shape: f32[128,2], index: 5, kind: input, shape index: {}]   ;;  %s1021_s6 = inlined_call_operand.vmem [shape: f32[1,2], index: 6, kind: input, shape index: {}]   ;;  %s1022_s7 = inlined_call_operand.vmem [shape: f32[32,2], index: 7, kind: output, shape index: {}]  }
   0x1 LB: > { %s633_s25 = sadd.s32 4294967295, %s841_s24   ;;  %p637_p0 = scmp.ge.s32.totalorder %s841_s24, 1  ;;  %s841_s24 = sphi %s883_s24, %s17_s24  }
   0x2   : > { %p238_p1 = scmp.lt.s32.totalorder %s841_s24, 3 }
   0x4   : > { %p239_p2 = pnand %p637_p0, %p238_p1 }
   0x5   : > { %v284_v0 = vld [vmem:[%s1016_s1] sm:$0xff] (!%p239_p2)  ;;  %s638_s28 = sshll.u32 (!%p239_p2), %s633_s25, 1  ;;  %v377_v2 = vld [vmem:[%s1018_s3 + $0x8] sm:$0xff] (!%p239_p2)  ;;  %v378_v4 = vld [vmem:[%s1018_s3 + $0x10] sm:$0xff] (!%p239_p2)  ;;  %vm292_vm0 = vcmask (!%p239_p2), 64512   ;;  %vm574_vm1 = vcmask (!%p239_p2), 15360  }
   0x6   : > { %242 = sbr.rel (%p239_p2) target bundleno = 670 (0x29e), region = 48  ;;  %v376_v1 = vld [vmem:[%s1018_s3] sm:$0xff] (!%p239_p2)  ;;  %688 = vmatprep.subr.mxu0 (!%p239_p2), %v284_v0  ;;  %p271_p3 = scmp.lt.s32.totalorder (!%p239_p2), %s638_s28, 3  ;;  %v379_v5 = vld [vmem:[%s1018_s3 + $0x18] sm:$0xff] (!%p239_p2)  ;;  %v381_v8 = vld [vmem:[%s1018_s3 + $0x28] sm:$0xff] (!%p239_p2) }
   0x7   : > { %v763_v3 = vpack.c.bf16 (!%p239_p2), %v377_v2, %v376_v1  ;;  %689 = vmatpush3.msra.mxu0 (!%p239_p2), %v284_v0  ;;  %v767_v6 = vpack.c.bf16 (!%p239_p2), %v379_v5, %v378_v4  ;;  %v380_v7 = vld [vmem:[%s1018_s3 + $0x20] sm:$0xff] (!%p239_p2)  ;;  %v382_v10 = vld [vmem:[%s1018_s3 + $0x30] sm:$0xff] (!%p239_p2)  ;;  %v383_v11 = vld [vmem:[%s1018_s3 + $0x38] sm:$0xff] (!%p239_p2) }
   0x8   : > { %v771_v9 = vpack.c.bf16 (!%p239_p2), %v381_v8, %v380_v7  ;;  %v775_v14 = vpack.c.bf16 (!%p239_p2), %v383_v11, %v382_v10  ;;  %v384_v15 = vld [vmem:[%s1018_s3 + $0x40] sm:$0xff] (!%p239_p2)  ;;  %v385_v16 = vld [vmem:[%s1018_s3 + $0x48] sm:$0xff] (!%p239_p2)  ;;  %v386_v18 = vld [vmem:[%s1018_s3 + $0x50] sm:$0xff] (!%p239_p2) }
   0x9   : > { %764 = vmatprep.subr.bf16.mxu1 (!%p239_p2), %v763_v3  ;;  %v779_v17 = vpack.c.bf16 (!%p239_p2), %v385_v16, %v384_v15  ;;  %v387_v19 = vld [vmem:[%s1018_s3 + $0x58] sm:$0xff] (!%p239_p2)  ;;  %v388_v21 = vld [vmem:[%s1018_s3 + $0x60] sm:$0xff] (!%p239_p2)  ;;  %v389_v22 = vld [vmem:[%s1018_s3 + $0x68] sm:$0xff] (!%p239_p2) }
   0xa   : > { %766 = vmatpush3.bf16.msra.mxu1 (!%p239_p2), %v763_v3  ;;  %v783_v20 = vpack.c.bf16 (!%p239_p2), %v387_v19, %v386_v18  ;;  %v787_v23 = vpack.c.bf16 (!%p239_p2), %v389_v22, %v388_v21  ;;  %v390_v24 = vld [vmem:[%s1018_s3 + $0x70] sm:$0xff] (!%p239_p2)  ;;  %v391_v25 = vld [vmem:[%s1018_s3 + $0x78] sm:$0xff] (!%p239_p2)  ;;  %v476_v27 = vld [vmem:[%s1020_s5] sm:$0xff] (!%p239_p2) }
   0xb   : > { %768 = vmatprep.subr.bf16.mxu1 (!%p239_p2), %v767_v6  ;;  %v791_v26 = vpack.c.bf16 (!%p239_p2), %v391_v25, %v390_v24  ;;  %v477_v28 = vld [vmem:[%s1020_s5 + $0x8] sm:$0xff] (!%p239_p2)  ;;  %v478_v29 = vld [vmem:[%s1020_s5 + $0x10] sm:$0xff] (!%p239_p2)  ;;  %v479_v31 = vld [vmem:[%s1020_s5 + $0x18] sm:$0xff] (!%p239_p2) }
   0xc   : > { %v795_v30 = vpack.c.bf16 (!%p239_p2), %v477_v28, %v476_v27  ;;  %v799_v32 = vpack.c.bf16 (!%p239_p2), %v479_v31, %v478_v29  ;;  %v480_v33 = vld [vmem:[%s1020_s5 + $0x20] sm:$0xff] (!%p239_p2)  ;;  %v481_v34 = vld [vmem:[%s1020_s5 + $0x28] sm:$0xff] (!%p239_p2)  ;;  %v482_v36 = vld [vmem:[%s1020_s5 + $0x30] sm:$0xff] (!%p239_p2) }
   0xd   : > { %s1024_s28 = smov (!%p271_p3, %s638_s28), 3  ;;  %v803_v35 = vpack.c.bf16 %v481_v34, %v480_v33  ;;  %v483_v37 = vld [vmem:[%s1020_s5 + $0x38] sm:$0xff]  ;;  %v484_v39 = vld [vmem:[%s1020_s5 + $0x40] sm:$0xff]  ;;  %v485_v40 = vld [vmem:[%s1020_s5 + $0x48] sm:$0xff] }
   0xe   : > { %s639_s18 = sshll.u32 %s1024_s28, 3  ;;  %770 = vmatpush3.bf16.msra.mxu1 %v767_v6  ;;  %796 = vmatprep.subr.bf16.mxu0 %v795_v30  ;;  %v807_v38 = vpack.c.bf16 %v483_v37, %v482_v36  ;;  %v811_v41 = vpack.c.bf16 %v485_v40, %v484_v39  ;;  %v486_v42 = vld [vmem:[%s1020_s5 + $0x50] sm:$0xff]  ;;  %v487_v43 = vld [vmem:[%s1020_s5 + $0x58] sm:$0xff]  ;;  %v488_v45 = vld [vmem:[%s1020_s5 + $0x60] sm:$0xff] }
   0xf   : > { %s274_s21 = scalar_lea.vmem %s1015_s0, %s639_s18  ;;  %772 = vmatprep.subr.bf16.mxu1 %v771_v9  ;;  %v815_v44 = vpack.c.bf16 %v487_v43, %v486_v42  ;;  %v489_v46 = vld [vmem:[%s1020_s5 + $0x68] sm:$0xff]  ;;  %v642_v48 = vld [vmem:[%s1017_s2] ss:$0 sm:$0xff]  ;;  %v490_v55 = vld [vmem:[%s1020_s5 + $0x70] sm:$0xff]  ;;  %s280_s22 = scalar_lea.vmem %s1022_s7, %s639_s18 }
  0x10   : > { %v282_v12 = vld [vmem:[%s274_s21] sm:$0xff]  ;;  %v283_v13 = vld [vmem:[%s274_s21 + $0x8] sm:$0xff]  ;;  %v819_v47 = vpack.c.bf16 %v489_v46, %v488_v45  ;;  %v491_v56 = vld [vmem:[%s1020_s5 + $0x78] sm:$0xff] }
  0x11   : > { %690 = vmatprep.mubr.msk.f32.mxu0 %vm292_vm0, %v282_v12  ;;  %v823_v57 = vpack.c.bf16 %v491_v56, %v490_v55  ;;  %v645_v58 = vld [vmem:[%s1019_s4] ss:$0 sm:$0xff] }
  0x12   : > { %691 = vmatmul.mubr.msk.f32.vlgmr.msra.gmra.mrb[0].mxu0 %vm292_vm0, %v283_v13  ;;  %774 = vmatpush3.bf16.msra.mxu1 %v771_v9  ;;  %v646_v1 = vld [vmem:[%s1021_s6] ss:$0 sm:$0xff] }
  0x13   : > { %776 = vmatprep.subr.bf16.mxu1 %v775_v14  ;;  %798 = vmatpush3.bf16.msra.mxu0 %v795_v30 }
  0x14   : > { %800 = vmatprep.subr.bf16.mxu0 %v799_v32 }
  0x16   : > { %778 = vmatpush3.bf16.msra.mxu1 %v775_v14 }
  0x17   : > { %780 = vmatprep.subr.bf16.mxu1 %v779_v17  ;;  %802 = vmatpush3.bf16.msra.mxu0 %v799_v32 }
  0x18   : > { %804 = vmatprep.subr.bf16.mxu0 %v803_v35 }
  0x1a   : > { %782 = vmatpush3.bf16.msra.mxu1 %v779_v17 }
  0x1b   : > { %784 = vmatprep.subr.bf16.mxu1 %v783_v20  ;;  %806 = vmatpush3.bf16.msra.mxu0 %v803_v35 }
  0x1c   : > { %808 = vmatprep.subr.bf16.mxu0 %v807_v38 }
  0x1e   : > { %786 = vmatpush3.bf16.msra.mxu1 %v783_v20 }
  0x1f   : > { %788 = vmatprep.subr.bf16.mxu1 %v787_v23  ;;  %810 = vmatpush3.bf16.msra.mxu0 %v807_v38 }
  0x20   : > { %812 = vmatprep.subr.bf16.mxu0 %v811_v41 }
  0x22   : > { %790 = vmatpush3.bf16.msra.mxu1 %v787_v23 }
  0x23   : > { %792 = vmatprep.subr.bf16.mxu1 %v791_v26  ;;  %814 = vmatpush3.bf16.msra.mxu0 %v811_v41 }
  0x24   : > { %816 = vmatprep.subr.bf16.mxu0 %v815_v44 }
  0x26   : > { %794 = vmatpush3.bf16.msra.mxu1 %v791_v26 }
  0x27   : > { %818 = vmatpush3.bf16.msra.mxu0 %v815_v44 }
  0x28   : > { %820 = vmatprep.subr.bf16.mxu0 %v819_v47 }
  0x2b   : > { %822 = vmatpush3.bf16.msra.mxu0 %v819_v47 }
  0x2c   : > { %824 = vmatprep.subr.bf16.mxu0 %v823_v57 }
  0x2f   : > { %826 = vmatpush3.bf16.msra.mxu0 %v823_v57 }
  0xe5   : > { %v692_v49 = vpop.f32.mrb[0].mxu0 }
  0xe6   : > { %v371_v50 = vadd.f32 %v692_v49, %v642_v48  ;;  %v365_v51 = vpop.f32.mrb[1].mxu0 }
  0xe7   : > { %v366_v52 = vadd.f32 %v642_v48, %v365_v51 }
  0xe8   : > { %v375_v54 = vmax.f32 %v371_v50, 0.0 }
  0xe9   : > { %v374_v53 = vmax.f32 %v366_v52, 0.0 }
  0xeb   : > { %725 = vmatprep.mubr.f32.mxu1 %v374_v53 }
  0xec   : > { %726 = vmatmul.mubr.f32.vlgmr.msra.gmra.mrb[0].mxu1 %v375_v54 }
 0x1bf   : > { %v727_v59 = vpop.f32.mrb[0].mxu1 }
 0x1c0   : > { %v471_v60 = vadd.f32 %v727_v59, %v645_v58  ;;  %v465_v61 = vpop.f32.mrb[1].mxu1 }
 0x1c1   : > { %v466_v62 = vadd.f32 %v645_v58, %v465_v61 }
 0x1c2   : > { %v475_v0 = vmax.f32 %v471_v60, 0.0 }
 0x1c3   : > { %v474_v63 = vmax.f32 %v466_v62, 0.0 }
 0x1c5   : > { %760 = vmatprep.mubr.f32.mxu0 %v474_v63 }
 0x1c6   : > { %761 = vmatmul.mubr.f32.vlgmr.msra.gmra.mrb[2].mxu0 %v475_v0 }
 0x299   : > { %v762_v2 = vpop.f32.mrb[2].mxu0 }
 0x29a   : > { %v565_v3 = vpop.f32.mrb[3].mxu0  ;;  %v571_v5 = vadd.f32 %v762_v2, %v646_v1 }
 0x29b   : > { %v566_v4 = vadd.f32 %v646_v1, %v565_v3 }
 0x29c   : > { %576 = vst.msk [vmem:[%s280_s22 + $0x8] sm:$0xff] %vm574_vm1, %v571_v5 }
 0x29d   : > { %575 = vst.msk [vmem:[%s280_s22] sm:$0xff] %vm574_vm1, %v566_v4 }
 0x29e PF: > { %s17_s24 = sadd.s32 1, %s841_s24  }
 0x29f   : > { %p14_p4 = scmp.ge.s32.totalorder %s17_s24, 4  }
 0x2a1   :  { %16 = sbr.rel (!%p14_p4) target bundleno = 1 (0x1), region = 78 }

</bundles_post_ra>
